<compile_context>
chip_gen: v7x
topology: tpu7x:2x2x1
jax: 0.10.0
libtpu: 0.0.40
codegen_flags: <defaults>
</compile_context>

<pallas_src>
import jax
import jax.numpy as jnp
import numpy as np
from jax.experimental import pallas as pl
from jax.experimental.pallas import tpu as pltpu

# ---- module hyperparameters (small, consistent with the module's __init__) ----
B = 2            # batch
N = 8            # sequence length
DIM = 32         # model dim
HEADS = 4
DIM_HEAD = 16
INNER = HEADS * DIM_HEAD           # 64
G = B * HEADS                      # fused (batch, head) dim = 8
SCALE = DIM_HEAD ** (-0.5)
LN_EPS = 1e-5


def attention_kernel(x_ref, gamma_ref, beta_ref, wq_ref, wk_ref, wv_ref,
                     wout_ref, bout_ref, out_ref, attn_ref):
    # ---- LayerNorm over last dim (biased variance, like torch.nn.LayerNorm) ----
    x = x_ref[...].astype(jnp.float32)                               # (B, N, D)
    mean = jnp.mean(x, axis=-1, keepdims=True)
    var = jnp.mean((x - mean) ** 2, axis=-1, keepdims=True)
    xn = (x - mean) * jax.lax.rsqrt(var + LN_EPS)
    xn = xn * gamma_ref[...] + beta_ref[...]                         # (B, N, D)

    # Replicate the normalized activations across heads: (B,N,D) -> (G,N,D).
    # Only leading-dim broadcast/reshape -> no lane/sublane relayout.
    xn_g = jnp.broadcast_to(xn[:, None, :, :],
                            (B, HEADS, N, DIM)).reshape(G, N, DIM)

    # ---- Q/K/V projections as batched matmuls over G (no bias) ----
    q = jnp.einsum('gnd,gde->gne', xn_g, wq_ref[...],
                   preferred_element_type=jnp.float32)               # (G, N, Dh)
    k = jnp.einsum('gnd,gde->gne', xn_g, wk_ref[...],
                   preferred_element_type=jnp.float32)               # (G, N, Dh)
    v = jnp.einsum('gnd,gde->gne', xn_g, wv_ref[...],
                   preferred_element_type=jnp.float32)               # (G, N, Dh)

    # ---- scaled dot-product attention, batched over G ----
    scores = jnp.einsum('gnd,gmd->gnm', q, k,
                        preferred_element_type=jnp.float32) * SCALE  # (G, N, N)
    scores = scores - jnp.max(scores, axis=-1, keepdims=True)
    e = jnp.exp(scores)
    denom = jnp.sum(e, axis=-1, keepdims=True)
    attn = e * pl.reciprocal(denom, approx=False)                    # (G, N, N)
    # dropout p=0.0 -> identity; single store of the whole attention map
    attn_ref[...] = attn.astype(attn_ref.dtype)

    ctx = jnp.einsum('gnm,gmd->gnd', attn, v,
                     preferred_element_type=jnp.float32)             # (G, N, Dh)

    # ---- output projection without a lane concat:
    # per-head partials (G, N, D), then sum heads inside each batch element.
    part = jnp.einsum('gnd,gdo->gno', ctx, wout_ref[...],
                      preferred_element_type=jnp.float32)            # (G, N, D)
    out = jnp.sum(part.reshape(B, HEADS, N, DIM), axis=1)            # (B, N, D)
    out = out + bout_ref[...]
    out_ref[...] = out.astype(out_ref.dtype)


def attention_pallas(x, gamma, beta, w_qkv, w_out, b_out):
    """x: (B, N, DIM). Returns (out (B,N,DIM), attn (B,HEADS,N,N))."""
    # ---- wrapper-side (free) weight re-layout: per-head, replicated over batch ----
    def per_head_replicated(w_cols):            # (DIM, INNER) -> (G, DIM, Dh)
        w_h = w_cols.reshape(DIM, HEADS, DIM_HEAD).transpose(1, 0, 2)  # (H, D, Dh)
        return jnp.broadcast_to(w_h[None], (B, HEADS, DIM, DIM_HEAD)
                                ).reshape(G, DIM, DIM_HEAD)

    wq_g = per_head_replicated(w_qkv[:, :INNER])
    wk_g = per_head_replicated(w_qkv[:, INNER:2 * INNER])
    wv_g = per_head_replicated(w_qkv[:, 2 * INNER:])

    wout_h = w_out.reshape(HEADS, DIM_HEAD, DIM)                       # (H, Dh, D)
    wout_g = jnp.broadcast_to(wout_h[None], (B, HEADS, DIM_HEAD, DIM)
                              ).reshape(G, DIM_HEAD, DIM)

    gamma2 = gamma.reshape(1, DIM)
    beta2 = beta.reshape(1, DIM)
    bout2 = b_out.reshape(1, DIM)

    # Single-step grid: whole problem (<50 KB) lives in VMEM; no per-batch
    # pipeline steps.  (On v7x, grid=(B,) + "parallel" would use both TCs.)
    out, attn_g = pl.pallas_call(
        attention_kernel,
        out_shape=(
            jax.ShapeDtypeStruct((B, N, DIM), x.dtype),
            jax.ShapeDtypeStruct((G, N, N), jnp.float32),
        ),
        grid=(1,),
        in_specs=[
            pl.BlockSpec((B, N, DIM), lambda i: (0, 0, 0)),            # x
            pl.BlockSpec((1, DIM), lambda i: (0, 0)),                  # gamma
            pl.BlockSpec((1, DIM), lambda i: (0, 0)),                  # beta
            pl.BlockSpec((G, DIM, DIM_HEAD), lambda i: (0, 0, 0)),     # Wq per (b,h)
            pl.BlockSpec((G, DIM, DIM_HEAD), lambda i: (0, 0, 0)),     # Wk per (b,h)
            pl.BlockSpec((G, DIM, DIM_HEAD), lambda i: (0, 0, 0)),     # Wv per (b,h)
            pl.BlockSpec((G, DIM_HEAD, DIM), lambda i: (0, 0, 0)),     # Wout per (b,h)
            pl.BlockSpec((1, DIM), lambda i: (0, 0)),                  # b_out
        ],
        out_specs=[
            pl.BlockSpec((B, N, DIM), lambda i: (0, 0, 0)),            # out
            pl.BlockSpec((G, N, N), lambda i: (0, 0, 0)),              # attn (fused B*H)
        ],
        compiler_params=pltpu.CompilerParams(
            dimension_semantics=("arbitrary",)),
    )(x, gamma2, beta2, wq_g, wk_g, wv_g, wout_g, bout2)

    attn = attn_g.reshape(B, HEADS, N, N)       # free layout plumbing in the wrapper
    return out, attn


def attention_reference(x, gamma, beta, w_qkv, w_out, b_out):
    """Plain JAX reference mirroring the PyTorch forward."""
    xf = x.astype(jnp.float32)
    mean = jnp.mean(xf, axis=-1, keepdims=True)
    var = jnp.mean((xf - mean) ** 2, axis=-1, keepdims=True)
    xn = (xf - mean) / jnp.sqrt(var + LN_EPS) * gamma + beta
    qkv = xn @ w_qkv                                             # (B, N, 3*INNER)
    q, k, v = jnp.split(qkv, 3, axis=-1)

    def to_heads(t):
        return t.reshape(B, N, HEADS, DIM_HEAD).transpose(0, 2, 1, 3)  # (B,H,N,Dh)

    q, k, v = map(to_heads, (q, k, v))
    dots = jnp.einsum("bhnd,bhmd->bhnm", q, k) * SCALE
    attn = jax.nn.softmax(dots, axis=-1)
    out = jnp.einsum("bhnm,bhmd->bhnd", attn, v)
    out = out.transpose(0, 2, 1, 3).reshape(B, N, INNER)
    out = out @ w_out + b_out
    return out.astype(x.dtype), attn


if __name__ == "__main__":
    key = jax.random.PRNGKey(0)
    k1, k2, k3, k4, k5 = jax.random.split(key, 5)

    # deterministic synthetic parameters (no checkpoint loading)
    x = jax.random.normal(k1, (B, N, DIM), dtype=jnp.float32)
    gamma = jnp.ones((DIM,), jnp.float32) + 0.1 * jax.random.normal(k2, (DIM,), jnp.float32)
    beta = 0.1 * jax.random.normal(k3, (DIM,), jnp.float32)
    w_qkv = jax.random.normal(k4, (DIM, 3 * INNER), dtype=jnp.float32) * (DIM ** -0.5)
    k5a, k5b = jax.random.split(k5)
    w_out = jax.random.normal(k5a, (INNER, DIM), dtype=jnp.float32) * (INNER ** -0.5)
    b_out = 0.01 * jax.random.normal(k5b, (DIM,), dtype=jnp.float32)

    out, attn = attention_pallas(x, gamma, beta, w_qkv, w_out, b_out)
    jax.block_until_ready((out, attn))

    ref_out, ref_attn = attention_reference(x, gamma, beta, w_qkv, w_out, b_out)
    np.testing.assert_allclose(np.asarray(out), np.asarray(ref_out), rtol=1e-4, atol=1e-4)
    np.testing.assert_allclose(np.asarray(attn), np.asarray(ref_attn), rtol=1e-4, atol=1e-4)

    print("KERNEL_OK")
</pallas_src>

<mosaic_0001>
module attributes {stable_mosaic.version = 11 : i64} {
  func.func @attention_kernel(%arg0: i32, %arg1: memref<2x8x32xf32, #tpu.memory_space<vmem>>, %arg2: memref<1x32xf32, #tpu.memory_space<vmem>>, %arg3: memref<1x32xf32, #tpu.memory_space<vmem>>, %arg4: memref<8x32x16xf32, #tpu.memory_space<vmem>>, %arg5: memref<8x32x16xf32, #tpu.memory_space<vmem>>, %arg6: memref<8x32x16xf32, #tpu.memory_space<vmem>>, %arg7: memref<8x16x32xf32, #tpu.memory_space<vmem>>, %arg8: memref<1x32xf32, #tpu.memory_space<vmem>>, %arg9: memref<2x8x32xf32, #tpu.memory_space<vmem>>, %arg10: memref<8x8x8xf32, #tpu.memory_space<vmem>>) attributes {dimension_semantics = [#tpu.dimension_semantics<arbitrary>], iteration_bounds = array<i64: 1>, scalar_prefetch = 0 : i64, scratch_operands = 0 : i64, tpu.core_type = #tpu.core_type<tc>, window_params = [{pipeline_mode = #tpu.pipeline_mode<synchronous>, transform_indices = @transform_0, window_bounds = array<i64: 2, 8, 32>}, {pipeline_mode = #tpu.pipeline_mode<synchronous>, transform_indices = @transform_1, window_bounds = array<i64: 1, 32>}, {pipeline_mode = #tpu.pipeline_mode<synchronous>, transform_indices = @transform_2, window_bounds = array<i64: 1, 32>}, {pipeline_mode = #tpu.pipeline_mode<synchronous>, transform_indices = @transform_3, window_bounds = array<i64: 8, 32, 16>}, {pipeline_mode = #tpu.pipeline_mode<synchronous>, transform_indices = @transform_4, window_bounds = array<i64: 8, 32, 16>}, {pipeline_mode = #tpu.pipeline_mode<synchronous>, transform_indices = @transform_5, window_bounds = array<i64: 8, 32, 16>}, {pipeline_mode = #tpu.pipeline_mode<synchronous>, transform_indices = @transform_6, window_bounds = array<i64: 8, 16, 32>}, {pipeline_mode = #tpu.pipeline_mode<synchronous>, transform_indices = @transform_7, window_bounds = array<i64: 1, 32>}, {pipeline_mode = #tpu.pipeline_mode<synchronous>, transform_indices = @transform_8, window_bounds = array<i64: 2, 8, 32>}, {pipeline_mode = #tpu.pipeline_mode<synchronous>, transform_indices = @transform_9, window_bounds = array<i64: 8, 8, 8>}]} {
    %c0 = arith.constant 0 : index
    %c0_0 = arith.constant 0 : index
    %c0_1 = arith.constant 0 : index
    %0 = vector.load %arg1[%c0, %c0_0, %c0_1] : memref<2x8x32xf32, #tpu.memory_space<vmem>>, vector<2x8x32xf32>
    %cst = arith.constant dense<0.000000e+00> : vector<2x8xf32>
    %1 = vector.multi_reduction <add>, %0, %cst [2] : vector<2x8x32xf32> to vector<2x8xf32>
    %2 = vector.shape_cast %1 : vector<2x8xf32> to vector<2x8x1xf32>
    %cst_2 = arith.constant 3.200000e+01 : f32
    %3 = vector.broadcast %cst_2 : f32 to vector<2x8x1xf32>
    %4 = arith.divf %2, %3 : vector<2x8x1xf32>
    %5 = vector.broadcast %4 : vector<2x8x1xf32> to vector<2x8x32xf32>
    %6 = arith.subf %0, %5 : vector<2x8x32xf32>
    %7 = arith.mulf %6, %6 : vector<2x8x32xf32>
    %cst_3 = arith.constant dense<0.000000e+00> : vector<2x8xf32>
    %8 = vector.multi_reduction <add>, %7, %cst_3 [2] : vector<2x8x32xf32> to vector<2x8xf32>
    %9 = vector.shape_cast %8 : vector<2x8xf32> to vector<2x8x1xf32>
    %cst_4 = arith.constant 3.200000e+01 : f32
    %10 = vector.broadcast %cst_4 : f32 to vector<2x8x1xf32>
    %11 = arith.divf %9, %10 : vector<2x8x1xf32>
    %12 = vector.broadcast %4 : vector<2x8x1xf32> to vector<2x8x32xf32>
    %13 = arith.subf %0, %12 : vector<2x8x32xf32>
    %cst_5 = arith.constant 9.99999974E-6 : f32
    %14 = vector.broadcast %cst_5 : f32 to vector<2x8x1xf32>
    %15 = arith.addf %11, %14 : vector<2x8x1xf32>
    %16 = math.rsqrt %15 : vector<2x8x1xf32>
    %17 = vector.broadcast %16 : vector<2x8x1xf32> to vector<2x8x32xf32>
    %18 = arith.mulf %13, %17 : vector<2x8x32xf32>
    %c0_6 = arith.constant 0 : index
    %c0_7 = arith.constant 0 : index
    %19 = vector.load %arg2[%c0_6, %c0_7] : memref<1x32xf32, #tpu.memory_space<vmem>>, vector<1x32xf32>
    %20 = vector.shape_cast %19 : vector<1x32xf32> to vector<1x1x32xf32>
    %21 = vector.broadcast %20 : vector<1x1x32xf32> to vector<2x8x32xf32>
    %22 = arith.mulf %18, %21 : vector<2x8x32xf32>
    %c0_8 = arith.constant 0 : index
    %c0_9 = arith.constant 0 : index
    %23 = vector.load %arg3[%c0_8, %c0_9] : memref<1x32xf32, #tpu.memory_space<vmem>>, vector<1x32xf32>
    %24 = vector.shape_cast %23 : vector<1x32xf32> to vector<1x1x32xf32>
    %25 = vector.broadcast %24 : vector<1x1x32xf32> to vector<2x8x32xf32>
    %26 = arith.addf %22, %25 : vector<2x8x32xf32>
    %27 = vector.shape_cast %26 : vector<2x8x32xf32> to vector<2x1x8x32xf32>
    %28 = vector.shape_cast %27 : vector<2x1x8x32xf32> to vector<2x1x8x32xf32>
    %29 = vector.broadcast %28 : vector<2x1x8x32xf32> to vector<2x4x8x32xf32>
    %30 = vector.shape_cast %29 : vector<2x4x8x32xf32> to vector<8x8x32xf32>
    %c0_10 = arith.constant 0 : index
    %c0_11 = arith.constant 0 : index
    %c0_12 = arith.constant 0 : index
    %31 = vector.load %arg4[%c0_10, %c0_11, %c0_12] : memref<8x32x16xf32, #tpu.memory_space<vmem>>, vector<8x32x16xf32>
    "tpu.trace_start"() <{level = 10 : i32, message = "gnd,gde->gne"}> : () -> ()
    %cst_13 = arith.constant dense<0.000000e+00> : vector<8x8x16xf32>
    %32 = tpu.matmul %30, %31, %cst_13 {dimension_numbers = #tpu.dot_dimension_numbers<[2], [1], [1], [2], [0, 0, 0, 1, 1, 2], [0], [0]>} : vector<8x8x32xf32>, vector<8x32x16xf32>, vector<8x8x16xf32> -> vector<8x8x16xf32>
    "tpu.trace_stop"() : () -> ()
    %c0_14 = arith.constant 0 : index
    %c0_15 = arith.constant 0 : index
    %c0_16 = arith.constant 0 : index
    %33 = vector.load %arg5[%c0_14, %c0_15, %c0_16] : memref<8x32x16xf32, #tpu.memory_space<vmem>>, vector<8x32x16xf32>
    "tpu.trace_start"() <{level = 10 : i32, message = "gnd,gde->gne"}> : () -> ()
    %cst_17 = arith.constant dense<0.000000e+00> : vector<8x8x16xf32>
    %34 = tpu.matmul %30, %33, %cst_17 {dimension_numbers = #tpu.dot_dimension_numbers<[2], [1], [1], [2], [0, 0, 0, 1, 1, 2], [0], [0]>} : vector<8x8x32xf32>, vector<8x32x16xf32>, vector<8x8x16xf32> -> vector<8x8x16xf32>
    "tpu.trace_stop"() : () -> ()
    %c0_18 = arith.constant 0 : index
    %c0_19 = arith.constant 0 : index
    %c0_20 = arith.constant 0 : index
    %35 = vector.load %arg6[%c0_18, %c0_19, %c0_20] : memref<8x32x16xf32, #tpu.memory_space<vmem>>, vector<8x32x16xf32>
    "tpu.trace_start"() <{level = 10 : i32, message = "gnd,gde->gne"}> : () -> ()
    %cst_21 = arith.constant dense<0.000000e+00> : vector<8x8x16xf32>
    %36 = tpu.matmul %30, %35, %cst_21 {dimension_numbers = #tpu.dot_dimension_numbers<[2], [1], [1], [2], [0, 0, 0, 1, 1, 2], [0], [0]>} : vector<8x8x32xf32>, vector<8x32x16xf32>, vector<8x8x16xf32> -> vector<8x8x16xf32>
    "tpu.trace_stop"() : () -> ()
    "tpu.trace_start"() <{level = 10 : i32, message = "gnd,gmd->gnm"}> : () -> ()
    %cst_22 = arith.constant dense<0.000000e+00> : vector<8x8x8xf32>
    %37 = tpu.matmul %32, %34, %cst_22 {dimension_numbers = #tpu.dot_dimension_numbers<[2], [2], [1], [1], [0, 0, 0, 1, 1, 1], [0], [0]>} : vector<8x8x16xf32>, vector<8x8x16xf32>, vector<8x8x8xf32> -> vector<8x8x8xf32>
    "tpu.trace_stop"() : () -> ()
    %cst_23 = arith.constant 2.500000e-01 : f32
    %38 = vector.broadcast %cst_23 : f32 to vector<8x8x8xf32>
    %39 = arith.mulf %37, %38 : vector<8x8x8xf32>
    %cst_24 = arith.constant dense<0xFF800000> : vector<8x8xf32>
    %40 = vector.multi_reduction <maximumf>, %39, %cst_24 [2] : vector<8x8x8xf32> to vector<8x8xf32>
    %41 = vector.shape_cast %40 : vector<8x8xf32> to vector<8x8x1xf32>
    %42 = vector.broadcast %41 : vector<8x8x1xf32> to vector<8x8x8xf32>
    %43 = arith.subf %39, %42 : vector<8x8x8xf32>
    %44 = math.exp %43 : vector<8x8x8xf32>
    %cst_25 = arith.constant dense<0.000000e+00> : vector<8x8xf32>
    %45 = vector.multi_reduction <add>, %44, %cst_25 [2] : vector<8x8x8xf32> to vector<8x8xf32>
    %46 = vector.shape_cast %45 : vector<8x8xf32> to vector<8x8x1xf32>
    %47 = tpu.reciprocal %46 : vector<8x8x1xf32> -> vector<8x8x1xf32>
    %48 = vector.broadcast %47 : vector<8x8x1xf32> to vector<8x8x8xf32>
    %49 = arith.mulf %44, %48 : vector<8x8x8xf32>
    %c0_26 = arith.constant 0 : index
    %c0_27 = arith.constant 0 : index
    %c0_28 = arith.constant 0 : index
    %50 = vector.load %arg10[%c0_26, %c0_27, %c0_28] : memref<8x8x8xf32, #tpu.memory_space<vmem>>, vector<8x8x8xf32>
    tpu.vector_store %arg10[%c0_26, %c0_27, %c0_28], %49 {strides = array<i32>} : memref<8x8x8xf32, #tpu.memory_space<vmem>>, vector<8x8x8xf32>,
    "tpu.trace_start"() <{level = 10 : i32, message = "gnm,gmd->gnd"}> : () -> ()
    %cst_29 = arith.constant dense<0.000000e+00> : vector<8x8x16xf32>
    %51 = tpu.matmul %49, %36, %cst_29 {dimension_numbers = #tpu.dot_dimension_numbers<[2], [1], [1], [2], [0, 0, 0, 1, 1, 2], [0], [0]>} : vector<8x8x8xf32>, vector<8x8x16xf32>, vector<8x8x16xf32> -> vector<8x8x16xf32>
    "tpu.trace_stop"() : () -> ()
    %c0_30 = arith.constant 0 : index
    %c0_31 = arith.constant 0 : index
    %c0_32 = arith.constant 0 : index
    %52 = vector.load %arg7[%c0_30, %c0_31, %c0_32] : memref<8x16x32xf32, #tpu.memory_space<vmem>>, vector<8x16x32xf32>
    "tpu.trace_start"() <{level = 10 : i32, message = "gnd,gdo->gno"}> : () -> ()
    %cst_33 = arith.constant dense<0.000000e+00> : vector<8x8x32xf32>
    %53 = tpu.matmul %51, %52, %cst_33 {dimension_numbers = #tpu.dot_dimension_numbers<[2], [1], [1], [2], [0, 0, 0, 1, 1, 2], [0], [0]>} : vector<8x8x16xf32>, vector<8x16x32xf32>, vector<8x8x32xf32> -> vector<8x8x32xf32>
    "tpu.trace_stop"() : () -> ()
    %54 = vector.shape_cast %53 : vector<8x8x32xf32> to vector<2x4x8x32xf32>
    %cst_34 = arith.constant dense<0.000000e+00> : vector<2x8x32xf32>
    %55 = vector.multi_reduction <add>, %54, %cst_34 [1] : vector<2x4x8x32xf32> to vector<2x8x32xf32>
    %c0_35 = arith.constant 0 : index
    %c0_36 = arith.constant 0 : index
    %56 = vector.load %arg8[%c0_35, %c0_36] : memref<1x32xf32, #tpu.memory_space<vmem>>, vector<1x32xf32>
    %57 = vector.shape_cast %56 : vector<1x32xf32> to vector<1x1x32xf32>
    %58 = vector.broadcast %57 : vector<1x1x32xf32> to vector<2x8x32xf32>
    %59 = arith.addf %55, %58 : vector<2x8x32xf32>
    %c0_37 = arith.constant 0 : index
    %c0_38 = arith.constant 0 : index
    %c0_39 = arith.constant 0 : index
    %60 = vector.load %arg9[%c0_37, %c0_38, %c0_39] : memref<2x8x32xf32, #tpu.memory_space<vmem>>, vector<2x8x32xf32>
    tpu.vector_store %arg9[%c0_37, %c0_38, %c0_39], %59 {strides = array<i32>} : memref<2x8x32xf32, #tpu.memory_space<vmem>>, vector<2x8x32xf32>,
    return
  }
  func.func @transform_0(%arg0: i32) -> (i32, i32, i32) {
    %c0_i32 = arith.constant 0 : i32
    %c0_i32_0 = arith.constant 0 : i32
    %c0_i32_1 = arith.constant 0 : i32
    %c0_i32_2 = arith.constant 0 : i32
    return %c0_i32, %c0_i32_0, %c0_i32_1 : i32, i32, i32
  }
  func.func @transform_1(%arg0: i32) -> (i32, i32) {
    %c0_i32 = arith.constant 0 : i32
    %c0_i32_0 = arith.constant 0 : i32
    %c0_i32_1 = arith.constant 0 : i32
    return %c0_i32, %c0_i32_0 : i32, i32
  }
  func.func @transform_2(%arg0: i32) -> (i32, i32) {
    %c0_i32 = arith.constant 0 : i32
    %c0_i32_0 = arith.constant 0 : i32
    %c0_i32_1 = arith.constant 0 : i32
    return %c0_i32, %c0_i32_0 : i32, i32
  }
  func.func @transform_3(%arg0: i32) -> (i32, i32, i32) {
    %c0_i32 = arith.constant 0 : i32
    %c0_i32_0 = arith.constant 0 : i32
    %c0_i32_1 = arith.constant 0 : i32
    %c0_i32_2 = arith.constant 0 : i32
    return %c0_i32, %c0_i32_0, %c0_i32_1 : i32, i32, i32
  }
  func.func @transform_4(%arg0: i32) -> (i32, i32, i32) {
    %c0_i32 = arith.constant 0 : i32
    %c0_i32_0 = arith.constant 0 : i32
    %c0_i32_1 = arith.constant 0 : i32
    %c0_i32_2 = arith.constant 0 : i32
    return %c0_i32, %c0_i32_0, %c0_i32_1 : i32, i32, i32
  }
  func.func @transform_5(%arg0: i32) -> (i32, i32, i32) {
    %c0_i32 = arith.constant 0 : i32
    %c0_i32_0 = arith.constant 0 : i32
    %c0_i32_1 = arith.constant 0 : i32
    %c0_i32_2 = arith.constant 0 : i32
    return %c0_i32, %c0_i32_0, %c0_i32_1 : i32, i32, i32
  }
  func.func @transform_6(%arg0: i32) -> (i32, i32, i32) {
    %c0_i32 = arith.constant 0 : i32
    %c0_i32_0 = arith.constant 0 : i32
    %c0_i32_1 = arith.constant 0 : i32
    %c0_i32_2 = arith.constant 0 : i32
    return %c0_i32, %c0_i32_0, %c0_i32_1 : i32, i32, i32
  }
  func.func @transform_7(%arg0: i32) -> (i32, i32) {
    %c0_i32 = arith.constant 0 : i32
    %c0_i32_0 = arith.constant 0 : i32
    %c0_i32_1 = arith.constant 0 : i32
    return %c0_i32, %c0_i32_0 : i32, i32
  }
  func.func @transform_8(%arg0: i32) -> (i32, i32, i32) {
    %c0_i32 = arith.constant 0 : i32
    %c0_i32_0 = arith.constant 0 : i32
    %c0_i32_1 = arith.constant 0 : i32
    %c0_i32_2 = arith.constant 0 : i32
    return %c0_i32, %c0_i32_0, %c0_i32_1 : i32, i32, i32
  }
  func.func @transform_9(%arg0: i32) -> (i32, i32, i32) {
    %c0_i32 = arith.constant 0 : i32
    %c0_i32_0 = arith.constant 0 : i32
    %c0_i32_1 = arith.constant 0 : i32
    %c0_i32_2 = arith.constant 0 : i32
    return %c0_i32, %c0_i32_0, %c0_i32_1 : i32, i32, i32
  }
}

</mosaic_0001>

<bundles_post_ra>
// kernel: tpu_custom_call.1
= control target key start
LH: loop header
LB: loop body
LE: loop exit
PB: predicated region body
PF: predicated region fallthrough
CT: control target
= control target key end

     0   :  { %15 = vsyncpa [#allocation3], 0  ;;  %vm35_vm0 = vcmask 261120   ;;  %s5471_s0 = inlined_call_operand.vmem [shape: f32[2,8,32], index: 0, kind: input, shape index: {}]   ;;  %s5472_s1 = inlined_call_operand.vmem [shape: f32[1,32], index: 1, kind: input, shape index: {}]   ;;  %s5473_s2 = inlined_call_operand.vmem [shape: f32[1,32], index: 2, kind: input, shape index: {}]   ;;  %s5474_s3 = inlined_call_operand.vmem [shape: f32[8,32,16], index: 3, kind: input, shape index: {}]   ;;  %s5475_s4 = inlined_call_operand.vmem [shape: f32[8,32,16], index: 4, kind: input, shape index: {}]   ;;  %s5476_s5 = inlined_call_operand.vmem [shape: f32[8,32,16], index: 5, kind: input, shape index: {}]   ;;  %s5477_s6 = inlined_call_operand.vmem [shape: f32[8,16,32], index: 6, kind: input, shape index: {}]   ;;  %s5478_s7 = inlined_call_operand.vmem [shape: f32[1,32], index: 7, kind: input, shape index: {}]   ;;  %s5479_s8 = inlined_call_operand.hbm [shape: f32[2,8,32], index: 8, kind: output, shape index: {0}]   ;;  %s5480_s9 = inlined_call_operand.hbm [shape: f32[8,8,8], index: 9, kind: output, shape index: {1}]  }
   0x1   :  { %v33_v0 = vld [vmem:[%s5471_s0] sm:$0xff]  ;;  %v34_v1 = vld [vmem:[%s5471_s0 + $0x8] sm:$0xff] }
   0x2   :  { %16 = vsyncpa [#allocation5], 0  ;;  %v36_v2 = vsel %vm35_vm0, %v33_v0, 0.0  ;;  %v39_v3 = vsel %vm35_vm0, %v34_v1, 0.0  ;;  %v81_v14 = vld [vmem:[%s5474_s3] sm:$0xff]  ;;  %v82_v15 = vld [vmem:[%s5474_s3 + $0x8] sm:$0xff] }
   0x3   :  { %37 = vadd.xlane.f32.xlu0 %v36_v2  ;;  %v85_v16 = vld [vmem:[%s5474_s3 + $0x20] sm:$0xff]  ;;  %v4454_v17 = vpack.c.bf16 %v82_v15, %v81_v14  ;;  %v86_v18 = vld [vmem:[%s5474_s3 + $0x28] sm:$0xff]  ;;  %v4712_v19 = vmov 0.0|0.0   ;;  %v83_v21 = vld [vmem:[%s5474_s3 + $0x10] sm:$0xff]  ;;  %vm4713_vm1 = vmmov 0   ;;  %v4714_v27 = vmov 0.0  }
   0x4   :  { %4453 = vmatprep.subr.bf16.mxu0 %v4712_v19  ;;  %4459 = vmatprep.subr.bf16.mxu1 %v4712_v19  ;;  %v4460_v20 = vpack.c.bf16 %v86_v18, %v85_v16  ;;  %v84_v22 = vld [vmem:[%s5474_s3 + $0x18] sm:$0xff]  ;;  %v87_v23 = vld [vmem:[%s5474_s3 + $0x30] sm:$0xff]  ;;  %v3818_v35 = vld [vmem:[%s5472_s1] ss:$0 sm:$0xff]  ;;  %vm1863_vm2 = vcmask 130048   ;;  %vm2480_vm3 = vcmask 64512  }
   0x5   :  { %4455 = vmatpush3.bf16.msra.mxu0 %v4454_v17  ;;  %v4457_v24 = vpack.c.bf16 %v84_v22, %v83_v21  ;;  %v88_v25 = vld [vmem:[%s5474_s3 + $0x38] sm:$0xff]  ;;  %4061 = vmatprep.mubr.msk.f32.mxu0 %vm4713_vm1, %v4714_v27  ;;  %v89_v36 = vld [vmem:[%s5474_s3 + $0x40] sm:$0xff]  ;;  %v90_v38 = vld [vmem:[%s5474_s3 + $0x48] sm:$0xff] }
   0x6   :  { %4461 = vmatpush3.bf16.msra.mxu1 %v4460_v20  ;;  %4456 = vmatprep.subr.bf16.mxu0 %v4712_v19  ;;  %v4463_v26 = vpack.c.bf16 %v88_v25, %v87_v23  ;;  %v93_v39 = vld [vmem:[%s5474_s3 + $0x60] sm:$0xff]  ;;  %v94_v40 = vld [vmem:[%s5474_s3 + $0x68] sm:$0xff]  ;;  %v4466_v43 = vpack.c.bf16 %v90_v38, %v89_v36  ;;  %v91_v45 = vld [vmem:[%s5474_s3 + $0x50] sm:$0xff] }
   0x7   :  { %40 = vadd.xlane.f32.xlu0 %v39_v3  ;;  %4462 = vmatprep.subr.bf16.mxu1 %v4712_v19  ;;  %v3819_v41 = vld [vmem:[%s5473_s2] ss:$0 sm:$0xff]  ;;  %v4472_v44 = vpack.c.bf16 %v94_v40, %v93_v39  ;;  %v92_v47 = vld [vmem:[%s5474_s3 + $0x58] sm:$0xff]  ;;  %v95_v48 = vld [vmem:[%s5474_s3 + $0x70] sm:$0xff] }
   0x8   :  { %4072 = vmatprep.mubr.msk.f32.mxu1 %vm4713_vm1, %v4714_v27  ;;  %v96_v49 = vld [vmem:[%s5474_s3 + $0x78] sm:$0xff]  ;;  %v4469_v50 = vpack.c.bf16 %v92_v47, %v91_v45  ;;  %v97_v52 = vld [vmem:[%s5474_s3 + $0x80] sm:$0xff]  ;;  %v98_v53 = vld [vmem:[%s5474_s3 + $0x88] sm:$0xff] }
   0x9   :  { %4458 = vmatpush3.bf16.msra.mxu0 %v4457_v24  ;;  %v4475_v51 = vpack.c.bf16 %v96_v49, %v95_v48  ;;  %v101_v54 = vld [vmem:[%s5474_s3 + $0xa0] sm:$0xff]  ;;  %v102_v55 = vld [vmem:[%s5474_s3 + $0xa8] sm:$0xff]  ;;  %v4478_v57 = vpack.c.bf16 %v98_v53, %v97_v52  ;;  %v99_v59 = vld [vmem:[%s5474_s3 + $0x90] sm:$0xff] }
   0xa   :  { %4464 = vmatpush3.bf16.msra.mxu1 %v4463_v26  ;;  %4465 = vmatprep.subr.bf16.mxu0 %v4712_v19  ;;  %v4484_v58 = vpack.c.bf16 %v102_v55, %v101_v54  ;;  %v100_v61 = vld [vmem:[%s5474_s3 + $0x98] sm:$0xff]  ;;  %v103_v62 = vld [vmem:[%s5474_s3 + $0xb0] sm:$0xff]  ;;  %v105_v2 = vld [vmem:[%s5474_s3 + $0xc0] sm:$0xff] }
   0xb   :  { %4471 = vmatprep.subr.bf16.mxu1 %v4712_v19  ;;  %v104_v63 = vld [vmem:[%s5474_s3 + $0xb8] sm:$0xff]  ;;  %v679_v16 = vld [vmem:[%s5475_s4] sm:$0xff]  ;;  %v680_v17 = vld [vmem:[%s5475_s4 + $0x8] sm:$0xff] }
   0xc   :  { %v683_v18 = vld [vmem:[%s5475_s4 + $0x20] sm:$0xff]  ;;  %v684_v20 = vld [vmem:[%s5475_s4 + $0x28] sm:$0xff]  ;;  %v4502_v21 = vpack.c.bf16 %v680_v17, %v679_v16  ;;  %v681_v23 = vld [vmem:[%s5475_s4 + $0x10] sm:$0xff] }
   0xd   :  { %v4508_v22 = vpack.c.bf16 %v684_v20, %v683_v18  ;;  %v682_v24 = vld [vmem:[%s5475_s4 + $0x18] sm:$0xff]  ;;  %v685_v25 = vld [vmem:[%s5475_s4 + $0x30] sm:$0xff]  ;;  %v700_v45 = vld [vmem:[%s5475_s4 + $0xa8] sm:$0xff] }
   0xe   :  { %v686_v26 = vld [vmem:[%s5475_s4 + $0x38] sm:$0xff]  ;;  %v689_v36 = vld [vmem:[%s5475_s4 + $0x50] sm:$0xff]  ;;  %v703_v55 = vld [vmem:[%s5475_s4 + $0xc0] sm:$0xff] }
   0xf   :  { %v693_v38 = vld [vmem:[%s5475_s4 + $0x70] sm:$0xff]  ;;  %v694_v39 = vld [vmem:[%s5475_s4 + $0x78] sm:$0xff]  ;;  %v1279_v16 = vld [vmem:[%s5476_s5 + $0x40] sm:$0xff] }
  0x10   :  { %v697_v49 = vld [vmem:[%s5475_s4 + $0x90] sm:$0xff]  ;;  %v702_v52 = vld [vmem:[%s5475_s4 + $0xb8] sm:$0xff]  ;;  %v1280_v17 = vld [vmem:[%s5476_s5 + $0x48] sm:$0xff] }
  0x11   :  { %v1283_v18 = vld [vmem:[%s5476_s5 + $0x60] sm:$0xff]  ;;  %v1284_v20 = vld [vmem:[%s5476_s5 + $0x68] sm:$0xff] }
  0x90   :  { %v38_v4 = vpop.xlane.xlu0 %37 }
  0x91   :  { %v43_v5 = vmul.f32 0.03125, %v38_v4  ;;  %v106_v4 = vld [vmem:[%s5474_s3 + $0xc8] sm:$0xff] }
  0x93   :  { %v45_v6 = vsub.f32 %v33_v0, %v43_v5  ;;  %v4481_v0 = vpack.c.bf16 %v100_v61, %v99_v59  ;;  %v109_v5 = vld [vmem:[%s5474_s3 + $0xe0] sm:$0xff]  ;;  %v705_v61 = vld [vmem:[%s5475_s4 + $0xd0] sm:$0xff] }
  0x94   :  { %v41_v7 = vpop.xlane.xlu0 %40 }
  0x95   :  { %v44_v8 = vmul.f32 0.03125, %v41_v7  ;;  %v47_v9 = vmul.f32 %v45_v6, %v45_v6  ;;  %v4490_v7 = vpack.c.bf16 %v106_v4, %v105_v2  ;;  %v1272_v4 = vld [vmem:[%s5476_s5 + $0x8] sm:$0xff] }
  0x97   :  { %v4777_v10 = vsub.f32 %v34_v1, %v44_v8  ;;  %v49_v11 = vsel %vm35_vm0, %v47_v9, 0.0  ;;  %v4487_v1 = vpack.c.bf16 %v104_v63, %v103_v62  ;;  %v107_v9 = vld [vmem:[%s5474_s3 + $0xd0] sm:$0xff]  ;;  %v706_v62 = vld [vmem:[%s5475_s4 + $0xd8] sm:$0xff] }
  0x98   :  { %50 = vadd.xlane.f32.xlu1 %v49_v11  ;;  %v108_v11 = vld [vmem:[%s5474_s3 + $0xd8] sm:$0xff]  ;;  %v709_v63 = vld [vmem:[%s5475_s4 + $0xf0] sm:$0xff] }
  0x99   :  { %v48_v12 = vmul.f32 %v4777_v10, %v4777_v10  ;;  %v4493_v14 = vpack.c.bf16 %v108_v11, %v107_v9  ;;  %v1273_v9 = vld [vmem:[%s5476_s5 + $0x10] sm:$0xff]  ;;  %v1274_v11 = vld [vmem:[%s5476_s5 + $0x18] sm:$0xff] }
  0x9b   :  { %v52_v13 = vsel %vm35_vm0, %v48_v12, 0.0  ;;  %v111_v12 = vld [vmem:[%s5474_s3 + $0xf0] sm:$0xff] }
  0x9c   :  { %53 = vadd.xlane.f32.xlu1 %v52_v13  ;;  %v112_v13 = vld [vmem:[%s5474_s3 + $0xf8] sm:$0xff] }
  0x9d   :  { %v4499_v15 = vpack.c.bf16 %v112_v13, %v111_v12  ;;  %v1277_v12 = vld [vmem:[%s5476_s5 + $0x30] sm:$0xff]  ;;  %v1278_v13 = vld [vmem:[%s5476_s5 + $0x38] sm:$0xff] }
 0x125   :  { %v51_v28 = vpop.xlane.xlu1 %50 }
 0x126   :  { %v55_v29 = vmul.f32 0.03125, %v51_v28  ;;  %v4505_v28 = vpack.c.bf16 %v682_v24, %v681_v23  ;;  %v1281_v23 = vld [vmem:[%s5476_s5 + $0x50] sm:$0xff]  ;;  %v1282_v24 = vld [vmem:[%s5476_s5 + $0x58] sm:$0xff] }
 0x128   :  { %v57_v30 = vadd.f32 1e-05, %v55_v29  ;;  %v4511_v29 = vpack.c.bf16 %v686_v26, %v685_v25  ;;  %v1285_v25 = vld [vmem:[%s5476_s5 + $0x70] sm:$0xff]  ;;  %v1286_v26 = vld [vmem:[%s5476_s5 + $0x78] sm:$0xff] }
 0x129   :  { %v54_v31 = vpop.xlane.xlu1 %53 }
 0x12a   :  { %4628 = vrsqrt.f32 %v57_v30  ;;  %v56_v32 = vmul.f32 0.03125, %v54_v31  ;;  %v687_v30 = vld [vmem:[%s5475_s4 + $0x40] sm:$0xff]  ;;  %v688_v31 = vld [vmem:[%s5475_s4 + $0x48] sm:$0xff] }
 0x12c   :  { %v58_v33 = vadd.f32 1e-05, %v56_v32  ;;  %v691_v32 = vld [vmem:[%s5475_s4 + $0x60] sm:$0xff] }
 0x12e   :  { %4630 = vrsqrt.f32 %v58_v33  ;;  %v692_v33 = vld [vmem:[%s5475_s4 + $0x68] sm:$0xff] }
 0x134   :  { %v4629_v34 = vpop.eup %4628 }
 0x135   :  { %v61_v37 = vmul.f32 %v4629_v34, %v45_v6  ;;  %v110_v6 = vld [vmem:[%s5474_s3 + $0xe8] sm:$0xff]  ;;  %v4514_v34 = vpack.c.bf16 %v688_v31, %v687_v30  ;;  %v1287_v30 = vld [vmem:[%s5476_s5 + $0x80] sm:$0xff] }
 0x136   :  { %v4496_v8 = vpack.c.bf16 %v110_v6, %v109_v5  ;;  %v1275_v5 = vld [vmem:[%s5476_s5 + $0x20] sm:$0xff]  ;;  %v1276_v6 = vld [vmem:[%s5476_s5 + $0x28] sm:$0xff] }
 0x137   :  { %v70_v42 = vmul.f32 %v3818_v35, %v61_v37  ;;  %v690_v37 = vld [vmem:[%s5475_s4 + $0x58] sm:$0xff]  ;;  %v1288_v31 = vld [vmem:[%s5476_s5 + $0x88] sm:$0xff] }
 0x138   :  { %v4631_v56 = vpop.eup %4630  ;;  %v4517_v40 = vpack.c.bf16 %v690_v37, %v689_v36  ;;  %v1289_v36 = vld [vmem:[%s5476_s5 + $0x90] sm:$0xff]  ;;  %v1290_v37 = vld [vmem:[%s5476_s5 + $0x98] sm:$0xff] }
 0x139   :  { %v4838_v46 = vadd.f32 %v3819_v41, %v70_v42  ;;  %v62_v60 = vmul.f32 %v4631_v56, %v4777_v10  ;;  %v695_v42 = vld [vmem:[%s5475_s4 + $0x80] sm:$0xff]  ;;  %v704_v56 = vld [vmem:[%s5475_s4 + $0xc8] sm:$0xff] }
 0x13a   :  { %v4538_v59 = vpack.c.bf16 %v704_v56, %v703_v55 }
 0x13b   :  { %4062 = vmatmul.mubr.msk.f32.vlgmr.msra.gmra.mrb[0].mxu0 %vm35_vm0, %v4838_v46  ;;  %4073 = vmatmul.mubr.msk.f32.vlgmr.msra.gmra.mrb[0].mxu1 %vm35_vm0, %v4838_v46  ;;  %v71_v3 = vmul.f32 %v3818_v35, %v62_v60  ;;  %v4520_v35 = vpack.c.bf16 %v692_v33, %v691_v32  ;;  %v1291_v32 = vld [vmem:[%s5476_s5 + $0xa0] sm:$0xff]  ;;  %v1292_v33 = vld [vmem:[%s5476_s5 + $0xa8] sm:$0xff] }
 0x13c   :  { %4467 = vmatpush3.bf16.msra.mxu0 %v4466_v43  ;;  %4473 = vmatpush3.bf16.msra.mxu1 %v4472_v44  ;;  %v696_v43 = vld [vmem:[%s5475_s4 + $0x88] sm:$0xff]  ;;  %v699_v44 = vld [vmem:[%s5475_s4 + $0xa0] sm:$0xff] }
 0x13d   :  { %4468 = vmatprep.subr.bf16.mxu0 %v4712_v19  ;;  %4474 = vmatprep.subr.bf16.mxu1 %v4712_v19  ;;  %v4911_v10 = vadd.f32 %v3819_v41, %v71_v3  ;;  %v4523_v41 = vpack.c.bf16 %v694_v39, %v693_v38  ;;  %v4526_v47 = vpack.c.bf16 %v696_v43, %v695_v42  ;;  %v1271_v3 = vld [vmem:[%s5476_s5] sm:$0xff]  ;;  %v1293_v38 = vld [vmem:[%s5476_s5 + $0xb0] sm:$0xff]  ;;  %v1294_v39 = vld [vmem:[%s5476_s5 + $0xb8] sm:$0xff] }
 0x13e   :  { %4083 = vmatprep.mubr.msk.f32.mxu0 %vm4713_vm1, %v4714_v27  ;;  %4094 = vmatprep.mubr.msk.f32.mxu1 %vm4713_vm1, %v4714_v27  ;;  %v4532_v48 = vpack.c.bf16 %v700_v45, %v699_v44  ;;  %v1295_v42 = vld [vmem:[%s5476_s5 + $0xc0] sm:$0xff]  ;;  %v1296_v43 = vld [vmem:[%s5476_s5 + $0xc8] sm:$0xff] }
 0x13f   :  { %v1300_v44 = vld [vmem:[%s5476_s5 + $0xe8] sm:$0xff]  ;;  %v4586_v45 = vpack.c.bf16 %v1296_v43, %v1295_v42 }
 0x140   :  { %4470 = vmatpush3.bf16.msra.mxu0 %v4469_v50  ;;  %4476 = vmatpush3.bf16.msra.mxu1 %v4475_v51  ;;  %v698_v50 = vld [vmem:[%s5475_s4 + $0x98] sm:$0xff]  ;;  %v701_v51 = vld [vmem:[%s5475_s4 + $0xb0] sm:$0xff] }
 0x141   :  { %4477 = vmatprep.subr.bf16.mxu0 %v4712_v19  ;;  %4483 = vmatprep.subr.bf16.mxu1 %v4712_v19  ;;  %v4529_v53 = vpack.c.bf16 %v698_v50, %v697_v49  ;;  %v4535_v54 = vpack.c.bf16 %v702_v52, %v701_v51  ;;  %v1298_v49 = vld [vmem:[%s5476_s5 + $0xd8] sm:$0xff]  ;;  %v1301_v50 = vld [vmem:[%s5476_s5 + $0xf0] sm:$0xff] }
 0x142   :  { %v1302_v51 = vld [vmem:[%s5476_s5 + $0xf8] sm:$0xff] }
 0x143   :  { %4084 = vmatmul.mubr.msk.f32.vlgmr.msra.gmra.mrb[2].mxu0 %vm35_vm0, %v4838_v46  ;;  %4095 = vmatmul.mubr.msk.f32.vlgmr.msra.gmra.mrb[2].mxu1 %vm35_vm0, %v4838_v46 }
 0x144   :  { %4479 = vmatpush3.bf16.msra.mxu0 %v4478_v57  ;;  %4485 = vmatpush3.bf16.msra.mxu1 %v4484_v58  ;;  %v707_v57 = vld [vmem:[%s5475_s4 + $0xe0] sm:$0xff]  ;;  %v708_v58 = vld [vmem:[%s5475_s4 + $0xe8] sm:$0xff] }
 0x145   :  { %4480 = vmatprep.subr.bf16.mxu0 %v4712_v19  ;;  %4486 = vmatprep.subr.bf16.mxu1 %v4712_v19  ;;  %v4544_v60 = vpack.c.bf16 %v708_v58, %v707_v57 }
 0x146   :  { %4105 = vmatprep.mubr.msk.f32.mxu0 %vm4713_vm1, %v4714_v27  ;;  %4116 = vmatprep.mubr.msk.f32.mxu1 %vm4713_vm1, %v4714_v27 }
 0x148   :  { %4482 = vmatpush3.bf16.msra.mxu0 %v4481_v0  ;;  %4488 = vmatpush3.bf16.msra.mxu1 %v4487_v1  ;;  %v710_v0 = vld [vmem:[%s5475_s4 + $0xf8] sm:$0xff]  ;;  %v4541_v1 = vpack.c.bf16 %v706_v62, %v705_v61 }
 0x149   :  { %4489 = vmatprep.subr.bf16.mxu0 %v4712_v19  ;;  %4495 = vmatprep.subr.bf16.mxu1 %v4712_v19  ;;  %v4547_v2 = vpack.c.bf16 %v710_v0, %v709_v63 }
 0x14b   :  { %4106 = vmatmul.mubr.msk.f32.vlgmr.msra.gmra.mrb[4].mxu0 %vm35_vm0, %v4911_v10  ;;  %4117 = vmatmul.mubr.msk.f32.vlgmr.msra.gmra.mrb[4].mxu1 %vm35_vm0, %v4911_v10 }
 0x14c   :  { %4491 = vmatpush3.bf16.msra.mxu0 %v4490_v7  ;;  %4497 = vmatpush3.bf16.msra.mxu1 %v4496_v8  ;;  %v4550_v7 = vpack.c.bf16 %v1272_v4, %v1271_v3  ;;  %v4556_v8 = vpack.c.bf16 %v1276_v6, %v1275_v5 }
 0x14d   :  { %4492 = vmatprep.subr.bf16.mxu0 %v4712_v19  ;;  %4498 = vmatprep.subr.bf16.mxu1 %v4712_v19 }
 0x14e   :  { %4127 = vmatprep.mubr.msk.f32.mxu0 %vm4713_vm1, %v4714_v27  ;;  %4138 = vmatprep.mubr.msk.f32.mxu1 %vm4713_vm1, %v4714_v27 }
 0x150   :  { %4494 = vmatpush3.bf16.msra.mxu0 %v4493_v14  ;;  %4500 = vmatpush3.bf16.msra.mxu1 %v4499_v15  ;;  %v4553_v14 = vpack.c.bf16 %v1274_v11, %v1273_v9  ;;  %v4559_v15 = vpack.c.bf16 %v1278_v13, %v1277_v12 }
 0x151   :  { %4501 = vmatprep.subr.bf16.mxu0 %v4712_v19  ;;  %4507 = vmatprep.subr.bf16.mxu1 %v4712_v19 }
 0x153   :  { %4128 = vmatmul.mubr.msk.f32.vlgmr.msra.gmra.mrb[6].mxu0 %vm35_vm0, %v4911_v10  ;;  %4139 = vmatmul.mubr.msk.f32.vlgmr.msra.gmra.mrb[6].mxu1 %vm35_vm0, %v4911_v10 }
 0x154   :  { %4503 = vmatpush3.bf16.msra.mxu0 %v4502_v21  ;;  %4509 = vmatpush3.bf16.msra.mxu1 %v4508_v22  ;;  %v4562_v21 = vpack.c.bf16 %v1280_v17, %v1279_v16  ;;  %v4568_v22 = vpack.c.bf16 %v1284_v20, %v1283_v18 }
 0x155   :  { %4504 = vmatprep.subr.bf16.mxu0 %v4712_v19  ;;  %4510 = vmatprep.subr.bf16.mxu1 %v4712_v19 }
 0x156   :  { %4149 = vmatprep.mubr.msk.f32.mxu0 %vm4713_vm1, %v4714_v27  ;;  %4160 = vmatprep.mubr.msk.f32.mxu1 %vm4713_vm1, %v4714_v27 }
 0x158   :  { %4506 = vmatpush3.bf16.msra.mxu0 %v4505_v28  ;;  %4512 = vmatpush3.bf16.msra.mxu1 %v4511_v29  ;;  %v4565_v28 = vpack.c.bf16 %v1282_v24, %v1281_v23  ;;  %v4571_v29 = vpack.c.bf16 %v1286_v26, %v1285_v25 }
 0x159   :  { %4513 = vmatprep.subr.bf16.mxu0 %v4712_v19  ;;  %4519 = vmatprep.subr.bf16.mxu1 %v4712_v19 }
 0x15b   :  { %4150 = vmatmul.mubr.msk.f32.vlgmr.msra.gmra.mrb[8].mxu0 %vm35_vm0, %v4838_v46  ;;  %4161 = vmatmul.mubr.msk.f32.vlgmr.msra.gmra.mrb[8].mxu1 %vm35_vm0, %v4838_v46 }
 0x15c   :  { %4515 = vmatpush3.bf16.msra.mxu0 %v4514_v34  ;;  %4521 = vmatpush3.bf16.msra.mxu1 %v4520_v35  ;;  %v4574_v34 = vpack.c.bf16 %v1288_v31, %v1287_v30  ;;  %v4580_v35 = vpack.c.bf16 %v1292_v33, %v1291_v32 }
 0x15d   :  { %4516 = vmatprep.subr.bf16.mxu0 %v4712_v19  ;;  %4522 = vmatprep.subr.bf16.mxu1 %v4712_v19 }
 0x15e   :  { %4171 = vmatprep.mubr.msk.f32.mxu0 %vm4713_vm1, %v4714_v27  ;;  %4182 = vmatprep.mubr.msk.f32.mxu1 %vm4713_vm1, %v4714_v27 }
 0x160   :  { %4518 = vmatpush3.bf16.msra.mxu0 %v4517_v40  ;;  %4524 = vmatpush3.bf16.msra.mxu1 %v4523_v41  ;;  %v4577_v40 = vpack.c.bf16 %v1290_v37, %v1289_v36  ;;  %v4583_v41 = vpack.c.bf16 %v1294_v39, %v1293_v38 }
 0x161   :  { %4525 = vmatprep.subr.bf16.mxu0 %v4712_v19  ;;  %4531 = vmatprep.subr.bf16.mxu1 %v4712_v19 }
 0x163   :  { %4172 = vmatmul.mubr.msk.f32.vlgmr.msra.gmra.mrb[10].mxu0 %vm35_vm0, %v4838_v46  ;;  %4183 = vmatmul.mubr.msk.f32.vlgmr.msra.gmra.mrb[10].mxu1 %vm35_vm0, %v4838_v46 }
 0x164   :  { %4527 = vmatpush3.bf16.msra.mxu0 %v4526_v47  ;;  %4533 = vmatpush3.bf16.msra.mxu1 %v4532_v48  ;;  %v1297_v48 = vld [vmem:[%s5476_s5 + $0xd0] sm:$0xff] }
 0x165   :  { %4528 = vmatprep.subr.bf16.mxu0 %v4712_v19  ;;  %4534 = vmatprep.subr.bf16.mxu1 %v4712_v19  ;;  %v4589_v52 = vpack.c.bf16 %v1298_v49, %v1297_v48 }
 0x166   :  { %4193 = vmatprep.mubr.msk.f32.mxu0 %vm4713_vm1, %v4714_v27  ;;  %4204 = vmatprep.mubr.msk.f32.mxu1 %vm4713_vm1, %v4714_v27 }
 0x168   :  { %4530 = vmatpush3.bf16.msra.mxu0 %v4529_v53  ;;  %4536 = vmatpush3.bf16.msra.mxu1 %v4535_v54  ;;  %v4595_v53 = vpack.c.bf16 %v1302_v51, %v1301_v50 }
 0x169   :  { %4537 = vmatprep.subr.bf16.mxu0 %v4712_v19  ;;  %4543 = vmatprep.subr.bf16.mxu1 %v4712_v19 }
 0x16b   :  { %4194 = vmatmul.mubr.msk.f32.vlgmr.msra.gmra.mrb[12].mxu0 %vm35_vm0, %v4911_v10  ;;  %4205 = vmatmul.mubr.msk.f32.vlgmr.msra.gmra.mrb[12].mxu1 %vm35_vm0, %v4911_v10 }
 0x16c   :  { %4539 = vmatpush3.bf16.msra.mxu0 %v4538_v59  ;;  %4545 = vmatpush3.bf16.msra.mxu1 %v4544_v60 }
 0x16d   :  { %4540 = vmatprep.subr.bf16.mxu0 %v4712_v19  ;;  %4546 = vmatprep.subr.bf16.mxu1 %v4712_v19 }
 0x16e   :  { %4215 = vmatprep.mubr.msk.f32.mxu0 %vm4713_vm1, %v4714_v27  ;;  %4226 = vmatprep.mubr.msk.f32.mxu1 %vm4713_vm1, %v4714_v27 }
 0x170   :  { %4542 = vmatpush3.bf16.msra.mxu0 %v4541_v1  ;;  %4548 = vmatpush3.bf16.msra.mxu1 %v4547_v2 }
 0x171   :  { %4549 = vmatprep.subr.bf16.mxu0 %v4712_v19  ;;  %4555 = vmatprep.subr.bf16.mxu1 %v4712_v19 }
 0x173   :  { %4216 = vmatmul.mubr.msk.f32.vlgmr.msra.gmra.mrb[14].mxu0 %vm35_vm0, %v4911_v10  ;;  %4227 = vmatmul.mubr.msk.f32.vlgmr.msra.gmra.mrb[14].mxu1 %vm35_vm0, %v4911_v10 }
 0x174   :  { %4551 = vmatpush3.bf16.msra.mxu0 %v4550_v7  ;;  %4557 = vmatpush3.bf16.msra.mxu1 %v4556_v8 }
 0x175   :  { %4552 = vmatprep.subr.bf16.mxu0 %v4712_v19  ;;  %4558 = vmatprep.subr.bf16.mxu1 %v4712_v19 }
 0x176   :  { %4237 = vmatprep.mubr.msk.f32.mxu0 %vm4713_vm1, %v4714_v27  ;;  %4248 = vmatprep.mubr.msk.f32.mxu1 %vm4713_vm1, %v4714_v27 }
 0x178   :  { %4554 = vmatpush3.bf16.msra.mxu0 %v4553_v14  ;;  %4560 = vmatpush3.bf16.msra.mxu1 %v4559_v15 }
 0x179   :  { %4561 = vmatprep.subr.bf16.mxu0 %v4712_v19  ;;  %4567 = vmatprep.subr.bf16.mxu1 %v4712_v19 }
 0x17b   :  { %4238 = vmatmul.mubr.msk.f32.vlgmr.msra.gmra.mrb[16].mxu0 %vm35_vm0, %v4838_v46  ;;  %4249 = vmatmul.mubr.msk.f32.vlgmr.msra.gmra.mrb[16].mxu1 %vm35_vm0, %v4838_v46 }
 0x17c   :  { %4563 = vmatpush3.bf16.msra.mxu0 %v4562_v21  ;;  %4569 = vmatpush3.bf16.msra.mxu1 %v4568_v22 }
 0x17d   :  { %4564 = vmatprep.subr.bf16.mxu0 %v4712_v19  ;;  %4570 = vmatprep.subr.bf16.mxu1 %v4712_v19 }
 0x17e   :  { %4259 = vmatprep.mubr.msk.f32.mxu0 %vm4713_vm1, %v4714_v27  ;;  %4270 = vmatprep.mubr.msk.f32.mxu1 %vm4713_vm1, %v4714_v27 }
 0x180   :  { %4566 = vmatpush3.bf16.msra.mxu0 %v4565_v28  ;;  %4572 = vmatpush3.bf16.msra.mxu1 %v4571_v29 }
 0x181   :  { %4573 = vmatprep.subr.bf16.mxu0 %v4712_v19  ;;  %4579 = vmatprep.subr.bf16.mxu1 %v4712_v19 }
 0x183   :  { %4260 = vmatmul.mubr.msk.f32.vlgmr.msra.gmra.mrb[18].mxu0 %vm35_vm0, %v4838_v46  ;;  %4271 = vmatmul.mubr.msk.f32.vlgmr.msra.gmra.mrb[18].mxu1 %vm35_vm0, %v4838_v46  ;;  %v1299_v46 = vld [vmem:[%s5476_s5 + $0xe0] sm:$0xff] }
 0x184   :  { %4575 = vmatpush3.bf16.msra.mxu0 %v4574_v34  ;;  %4581 = vmatpush3.bf16.msra.mxu1 %v4580_v35  ;;  %v4592_v47 = vpack.c.bf16 %v1300_v44, %v1299_v46 }
 0x185   :  { %4576 = vmatprep.subr.bf16.mxu0 %v4712_v19  ;;  %4582 = vmatprep.subr.bf16.mxu1 %v4712_v19 }
 0x186   :  { %4281 = vmatprep.mubr.msk.f32.mxu0 %vm4713_vm1, %v4714_v27  ;;  %4292 = vmatprep.mubr.msk.f32.mxu1 %vm4713_vm1, %v4714_v27 }
 0x188   :  { %4578 = vmatpush3.bf16.msra.mxu0 %v4577_v40  ;;  %4584 = vmatpush3.bf16.msra.mxu1 %v4583_v41 }
 0x189   :  { %4585 = vmatprep.subr.bf16.mxu0 %v4712_v19  ;;  %4591 = vmatprep.subr.bf16.mxu1 %v4712_v19 }
 0x18b   :  { %4282 = vmatmul.mubr.msk.f32.vlgmr.msra.gmra.mrb[20].mxu0 %vm35_vm0, %v4911_v10  ;;  %4293 = vmatmul.mubr.msk.f32.vlgmr.msra.gmra.mrb[20].mxu1 %vm35_vm0, %v4911_v10 }
 0x18c   :  { %4587 = vmatpush3.bf16.msra.mxu0 %v4586_v45  ;;  %4593 = vmatpush3.bf16.msra.mxu1 %v4592_v47 }
 0x18d   :  { %4588 = vmatprep.subr.bf16.mxu0 %v4712_v19  ;;  %4594 = vmatprep.subr.bf16.mxu1 %v4712_v19 }
 0x18e   :  { %4303 = vmatprep.mubr.msk.f32.mxu0 %vm4713_vm1, %v4714_v27  ;;  %4314 = vmatprep.mubr.msk.f32.mxu1 %vm4713_vm1, %v4714_v27 }
 0x190   :  { %4590 = vmatpush3.bf16.msra.mxu0 %v4589_v52  ;;  %4596 = vmatpush3.bf16.msra.mxu1 %v4595_v53 }
 0x191   :  { %4317 = vmatprep.subr.mxu0 %v4714_v27  ;;  %4322 = vmatprep.subr.mxu1 %v4714_v27 }
 0x193   :  { %4304 = vmatmul.mubr.msk.f32.vlgmr.msra.gmra.mrb[22].mxu0 %vm35_vm0, %v4911_v10  ;;  %4315 = vmatmul.mubr.msk.f32.vlgmr.msra.gmra.mrb[22].mxu1 %vm35_vm0, %v4911_v10 }
 0x194   :  { %4319 = vmatprep.mubr.msk.f32.mxu0 %vm4713_vm1, %v4714_v27  ;;  %4324 = vmatprep.mubr.msk.f32.mxu1 %vm4713_vm1, %v4714_v27 }
 0x20e   :  { %v182_v54 = vpop.f32.mrb[0].mxu0  ;;  %v252_v55 = vpop.f32.mrb[0].mxu1 }
 0x20f   :  { %v4063_v56 = vpop.f32.mrb[1].mxu0  ;;  %v4074_v57 = vpop.f32.mrb[1].mxu1 }
 0x216   :  { %v322_v58 = vpop.f32.mrb[2].mxu0  ;;  %v392_v59 = vpop.f32.mrb[2].mxu1 }
 0x217   :  { %v4085_v60 = vpop.f32.mrb[3].mxu0  ;;  %v4096_v61 = vpop.f32.mrb[3].mxu1 }
 0x21e   :  { %v465_v62 = vpop.f32.mrb[4].mxu0  ;;  %v535_v63 = vpop.f32.mrb[4].mxu1 }
 0x21f   :  { %v4107_v0 = vpop.f32.mrb[5].mxu0  ;;  %v4118_v1 = vpop.f32.mrb[5].mxu1 }
 0x226   :  { %v605_v2 = vpop.f32.mrb[6].mxu0  ;;  %v675_v10 = vpop.f32.mrb[6].mxu1 }
 0x227   :  { %v4129_v3 = vpop.f32.mrb[7].mxu0  ;;  %v4140_v4 = vpop.f32.mrb[7].mxu1 }
 0x22e   :  { %v777_v5 = vpop.f32.mrb[8].mxu0  ;;  %v847_v6 = vpop.f32.mrb[8].mxu1 }
 0x22f   :  { %v4151_v7 = vpop.f32.mrb[9].mxu0  ;;  %v4162_v8 = vpop.f32.mrb[9].mxu1  ;;  %4318 = vmatpush3.xpose.msk.msra.mxu0 %vm1863_vm2, %v777_v5  ;;  %4323 = vmatpush3.xpose.msk.msra.mxu1 %vm1863_vm2, %v847_v6 }
 0x230   :  { %4327 = vmatprep.subr.mxu0 %v4714_v27  ;;  %4332 = vmatprep.subr.mxu1 %v4714_v27 }
 0x232   :  { %4320 = vmatmul.mubr.msk.f32.vlgmr.msra.gmra.mrb[24].mxu0 %vm1863_vm2, %v182_v54  ;;  %4325 = vmatmul.mubr.msk.f32.vlgmr.msra.gmra.mrb[24].mxu1 %vm1863_vm2, %v252_v55 }
 0x233   :  { %4329 = vmatprep.mubr.msk.f32.mxu0 %vm4713_vm1, %v4714_v27  ;;  %4334 = vmatprep.mubr.msk.f32.mxu1 %vm4713_vm1, %v4714_v27 }
 0x236   :  { %v917_v9 = vpop.f32.mrb[10].mxu0  ;;  %v987_v11 = vpop.f32.mrb[10].mxu1 }
 0x237   :  { %v4173_v12 = vpop.f32.mrb[11].mxu0  ;;  %v4184_v13 = vpop.f32.mrb[11].mxu1  ;;  %4328 = vmatpush3.xpose.msk.msra.mxu0 %vm1863_vm2, %v917_v9  ;;  %4333 = vmatpush3.xpose.msk.msra.mxu1 %vm1863_vm2, %v987_v11 }
 0x238   :  { %4337 = vmatprep.subr.mxu0 %v4714_v27  ;;  %4342 = vmatprep.subr.mxu1 %v4714_v27 }
 0x23a   :  { %4330 = vmatmul.mubr.msk.f32.vlgmr.msra.gmra.mrb[26].mxu0 %vm1863_vm2, %v322_v58  ;;  %4335 = vmatmul.mubr.msk.f32.vlgmr.msra.gmra.mrb[26].mxu1 %vm1863_vm2, %v392_v59 }
 0x23b   :  { %4339 = vmatprep.mubr.msk.f32.mxu0 %vm4713_vm1, %v4714_v27  ;;  %4344 = vmatprep.mubr.msk.f32.mxu1 %vm4713_vm1, %v4714_v27 }
 0x23e   :  { %v1057_v14 = vpop.f32.mrb[12].mxu0  ;;  %v1127_v15 = vpop.f32.mrb[12].mxu1 }
 0x23f   :  { %v4195_v16 = vpop.f32.mrb[13].mxu0  ;;  %v4206_v17 = vpop.f32.mrb[13].mxu1  ;;  %4338 = vmatpush3.xpose.msk.msra.mxu0 %vm1863_vm2, %v1057_v14  ;;  %4343 = vmatpush3.xpose.msk.msra.mxu1 %vm1863_vm2, %v1127_v15 }
 0x240   :  { %4347 = vmatprep.subr.mxu0 %v4714_v27  ;;  %4352 = vmatprep.subr.mxu1 %v4714_v27 }
 0x242   :  { %4340 = vmatmul.mubr.msk.f32.vlgmr.msra.gmra.mrb[28].mxu0 %vm1863_vm2, %v465_v62  ;;  %4345 = vmatmul.mubr.msk.f32.vlgmr.msra.gmra.mrb[28].mxu1 %vm1863_vm2, %v535_v63 }
 0x243   :  { %4349 = vmatprep.mubr.msk.f32.mxu0 %vm4713_vm1, %v4714_v27  ;;  %4354 = vmatprep.mubr.msk.f32.mxu1 %vm4713_vm1, %v4714_v27 }
 0x246   :  { %v1197_v18 = vpop.f32.mrb[14].mxu0  ;;  %v1267_v20 = vpop.f32.mrb[14].mxu1 }
 0x247   :  { %v4217_v21 = vpop.f32.mrb[15].mxu0  ;;  %v4228_v22 = vpop.f32.mrb[15].mxu1  ;;  %4348 = vmatpush3.xpose.msk.msra.mxu0 %vm1863_vm2, %v1197_v18  ;;  %4353 = vmatpush3.xpose.msk.msra.mxu1 %vm1863_vm2, %v1267_v20 }
 0x248   :  { %4357 = vmatprep.subr.mxu0 %v4714_v27  ;;  %4362 = vmatprep.subr.mxu1 %v4714_v27 }
 0x24a   :  { %4350 = vmatmul.mubr.msk.f32.vlgmr.msra.gmra.mrb[30].mxu0 %vm1863_vm2, %v605_v2  ;;  %4355 = vmatmul.mubr.msk.f32.vlgmr.msra.gmra.mrb[30].mxu1 %vm1863_vm2, %v675_v10 }
 0x24b   :  { %4359 = vmatprep.mubr.msk.f32.mxu0 %vm4713_vm1, %v4714_v27  ;;  %4364 = vmatprep.mubr.msk.f32.mxu1 %vm4713_vm1, %v4714_v27 }
 0x24e   :  { %v1369_v23 = vpop.f32.mrb[16].mxu0  ;;  %v1439_v24 = vpop.f32.mrb[16].mxu1 }
 0x24f   :  { %v4239_v25 = vpop.f32.mrb[17].mxu0  ;;  %v4250_v26 = vpop.f32.mrb[17].mxu1  ;;  %4358 = vmatpush3.msra.mxu0 %v1369_v23  ;;  %4363 = vmatpush3.msra.mxu1 %v1439_v24 }
 0x250   :  { %4367 = vmatprep.subr.mxu0 %v4714_v27  ;;  %4372 = vmatprep.subr.mxu1 %v4714_v27 }
 0x256   :  { %v5274_v28 = vpop.f32.mrb[18].mxu0  ;;  %v5276_v29 = vpop.f32.mrb[18].mxu1 }
 0x257   :  { %v4261_v30 = vpop.f32.mrb[19].mxu0  ;;  %v4272_v31 = vpop.f32.mrb[19].mxu1 }
 0x25e   :  { %v5278_v32 = vpop.f32.mrb[20].mxu0  ;;  %v5280_v33 = vpop.f32.mrb[20].mxu1 }
 0x25f   :  { %v4283_v34 = vpop.f32.mrb[21].mxu0  ;;  %v4294_v35 = vpop.f32.mrb[21].mxu1 }
 0x266   :  { %v5282_v36 = vpop.f32.mrb[22].mxu0  ;;  %v5284_v37 = vpop.f32.mrb[22].mxu1 }
 0x267   :  { %v4305_v38 = vpop.f32.mrb[23].mxu0  ;;  %v4316_v39 = vpop.f32.mrb[23].mxu1 }
 0x305   :  { %v1936_v40 = vpop.f32.mrb[24].mxu0  ;;  %v2012_v41 = vpop.f32.mrb[24].mxu1 }
 0x306   :  { %v2472_v42 = vmul.f32 0.25, %v1936_v40  ;;  %v2473_v43 = vmul.f32 0.25, %v2012_v41  ;;  %v4321_v46 = vpop.f32.mrb[25].mxu0  ;;  %v4326_v44 = vpop.f32.mrb[25].mxu1 }
 0x308   :  { %v2484_v45 = vsel %vm2480_vm3, %v2473_v43, -inf  ;;  %v2481_v47 = vsel %vm2480_vm3, %v2472_v42, -inf }
 0x309   :  { %2485 = vmax.xlane.f32.xlu1 %v2484_v45  ;;  %2482 = vmax.xlane.f32.xlu0 %v2481_v47 }
 0x30d   :  { %v2088_v48 = vpop.f32.mrb[26].mxu0  ;;  %v2164_v49 = vpop.f32.mrb[26].mxu1 }
 0x30e   :  { %v2474_v50 = vmul.f32 0.25, %v2088_v48  ;;  %v2475_v51 = vmul.f32 0.25, %v2164_v49  ;;  %v4331_v52 = vpop.f32.mrb[27].mxu0  ;;  %v4336_v53 = vpop.f32.mrb[27].mxu1 }
 0x310   :  { %v2490_v54 = vsel %vm2480_vm3, %v2475_v51, -inf  ;;  %v2487_v55 = vsel %vm2480_vm3, %v2474_v50, -inf }
 0x311   :  { %2491 = vmax.xlane.f32.xlu1 %v2490_v54  ;;  %2488 = vmax.xlane.f32.xlu0 %v2487_v55 }
 0x315   :  { %v2240_v56 = vpop.f32.mrb[28].mxu0  ;;  %v2316_v57 = vpop.f32.mrb[28].mxu1 }
 0x316   :  { %v2476_v58 = vmul.f32 0.25, %v2240_v56  ;;  %v2477_v59 = vmul.f32 0.25, %v2316_v57  ;;  %v4341_v60 = vpop.f32.mrb[29].mxu0  ;;  %v4346_v61 = vpop.f32.mrb[29].mxu1 }
 0x318   :  { %v2496_v62 = vsel %vm2480_vm3, %v2477_v59, -inf  ;;  %v2493_v63 = vsel %vm2480_vm3, %v2476_v58, -inf }
 0x319   :  { %2497 = vmax.xlane.f32.xlu1 %v2496_v62  ;;  %2494 = vmax.xlane.f32.xlu0 %v2493_v63 }
 0x31d   :  { %v2392_v0 = vpop.f32.mrb[30].mxu0  ;;  %v2468_v1 = vpop.f32.mrb[30].mxu1 }
 0x31e   :  { %v2478_v2 = vmul.f32 0.25, %v2392_v0  ;;  %v2479_v10 = vmul.f32 0.25, %v2468_v1  ;;  %v4351_v3 = vpop.f32.mrb[31].mxu0  ;;  %v4356_v4 = vpop.f32.mrb[31].mxu1 }
 0x320   :  { %v2502_v5 = vsel %vm2480_vm3, %v2479_v10, -inf  ;;  %v2499_v6 = vsel %vm2480_vm3, %v2478_v2, -inf }
 0x321   :  { %2503 = vmax.xlane.f32.xlu1 %v2502_v5  ;;  %2500 = vmax.xlane.f32.xlu0 %v2499_v6 }
 0x396   :  { %v2486_v7 = vpop.xlane.xlu1 %2485  ;;  %v2483_v8 = vpop.xlane.xlu0 %2482 }
 0x397   :  { %v2506_v9 = vsub.f32 %v2473_v43, %v2486_v7  ;;  %v2505_v11 = vsub.f32 %v2472_v42, %v2483_v8  ;;  %v3164_v8 = vld [vmem:[%s5477_s6 + $0x18] sm:$0xff] }
 0x399   :  { %v2515_v12 = vmul.f32 1.442695, %v2506_v9  ;;  %v2513_v13 = vmul.f32 1.442695, %v2505_v11 }
 0x39b   :  { %4632 = vpow2.f32 %v2515_v12 }
 0x39c   :  { %4634 = vpow2.f32 %v2513_v13 }
 0x39e   :  { %v2492_v14 = vpop.xlane.xlu1 %2491  ;;  %v2489_v15 = vpop.xlane.xlu0 %2488 }
 0x39f   :  { %v2508_v16 = vsub.f32 %v2475_v51, %v2492_v14  ;;  %v2507_v17 = vsub.f32 %v2474_v50, %v2489_v15 }
 0x3a1   :  { %v2519_v18 = vmul.f32 1.442695, %v2508_v16  ;;  %v2517_v20 = vmul.f32 1.442695, %v2507_v17  ;;  %v3167_v16 = vld [vmem:[%s5477_s6 + $0x30] sm:$0xff]  ;;  %v3168_v17 = vld [vmem:[%s5477_s6 + $0x38] sm:$0xff] }
 0x3a3   :  { %4636 = vpow2.f32 %v2519_v18  ;;  %v3165_v18 = vld [vmem:[%s5477_s6 + $0x20] sm:$0xff] }
 0x3a4   :  { %4638 = vpow2.f32 %v2517_v20  ;;  %v3166_v20 = vld [vmem:[%s5477_s6 + $0x28] sm:$0xff] }
 0x3a5   :  { %v4633_v21 = vpop.eup %4632 }
 0x3a6   :  { %v4635_v22 = vpop.eup %4634  ;;  %v2498_v23 = vpop.xlane.xlu1 %2497  ;;  %v2532_v25 = vsel %vm2480_vm3, %v4633_v21, 0.0 }
 0x3a7   :  { %v2495_v24 = vpop.xlane.xlu0 %2494  ;;  %v2510_v26 = vsub.f32 %v2477_v59, %v2498_v23  ;;  %2533 = vadd.xlane.f32.xlu1 %v2532_v25  ;;  %v2529_v31 = vsel %vm2480_vm3, %v4635_v22, 0.0 }
 0x3a8   :  { %v2509_v30 = vsub.f32 %v2476_v58, %v2495_v24  ;;  %2530 = vadd.xlane.f32.xlu0 %v2529_v31  ;;  %v3172_v31 = vld [vmem:[%s5477_s6 + $0x58] sm:$0xff] }
 0x3a9   :  { %v2523_v34 = vmul.f32 1.442695, %v2510_v26 }
 0x3aa   :  { %v2521_v35 = vmul.f32 1.442695, %v2509_v30  ;;  %v3171_v30 = vld [vmem:[%s5477_s6 + $0x50] sm:$0xff] }
 0x3ab   :  { %4640 = vpow2.f32 %v2523_v34  ;;  %v3169_v34 = vld [vmem:[%s5477_s6 + $0x40] sm:$0xff] }
 0x3ac   :  { %4642 = vpow2.f32 %v2521_v35  ;;  %v3170_v35 = vld [vmem:[%s5477_s6 + $0x48] sm:$0xff] }
 0x3ad   :  { %v4637_v38 = vpop.eup %4636 }
 0x3ae   :  { %v4639_v39 = vpop.eup %4638  ;;  %v2504_v40 = vpop.xlane.xlu1 %2503  ;;  %v2538_v42 = vsel %vm2480_vm3, %v4637_v38, 0.0 }
 0x3af   :  { %v2501_v41 = vpop.xlane.xlu0 %2500  ;;  %v2512_v43 = vsub.f32 %v2479_v10, %v2504_v40  ;;  %2539 = vadd.xlane.f32.xlu1 %v2538_v42  ;;  %v2535_v44 = vsel %vm2480_vm3, %v4639_v39, 0.0 }
 0x3b0   :  { %v2511_v46 = vsub.f32 %v2478_v2, %v2501_v41  ;;  %2536 = vadd.xlane.f32.xlu0 %v2535_v44  ;;  %v3176_v44 = vld [vmem:[%s5477_s6 + $0x78] sm:$0xff] }
 0x3b1   :  { %v2527_v45 = vmul.f32 1.442695, %v2512_v43 }
 0x3b2   :  { %v2525_v47 = vmul.f32 1.442695, %v2511_v46  ;;  %v3175_v46 = vld [vmem:[%s5477_s6 + $0x70] sm:$0xff] }
 0x3b3   :  { %4644 = vpow2.f32 %v2527_v45  ;;  %v3173_v45 = vld [vmem:[%s5477_s6 + $0x60] sm:$0xff] }
 0x3b4   :  { %4646 = vpow2.f32 %v2525_v47  ;;  %v3174_v47 = vld [vmem:[%s5477_s6 + $0x68] sm:$0xff] }
 0x3b5   :  { %v4641_v48 = vpop.eup %4640 }
 0x3b6   :  { %v4643_v49 = vpop.eup %4642  ;;  %v2544_v50 = vsel %vm2480_vm3, %v4641_v48, 0.0 }
 0x3b7   :  { %2545 = vadd.xlane.f32.xlu1 %v2544_v50  ;;  %v2541_v51 = vsel %vm2480_vm3, %v4643_v49, 0.0 }
 0x3b8   :  { %2542 = vadd.xlane.f32.xlu0 %v2541_v51 }
 0x3bd   :  { %v5300_v52 = vpop.eup %4644 }
 0x3be   :  { %v5302_v53 = vpop.eup %4646  ;;  %v2550_v54 = vsel %vm2480_vm3, %v5300_v52, 0.0 }
 0x3bf   :  { %2551 = vadd.xlane.f32.xlu1 %v2550_v54  ;;  %v2547_v55 = vsel %vm2480_vm3, %v5302_v53, 0.0 }
 0x3c0   :  { %2548 = vadd.xlane.f32.xlu0 %v2547_v55 }
 0x434   :  { %v2534_v56 = vpop.xlane.xlu1 %2533 }
 0x435   :  { %4648 = vrcp.f32 %v2534_v56  ;;  %v2531_v57 = vpop.xlane.xlu0 %2530 }
 0x436   :  { %4650 = vrcp.f32 %v2531_v57 }
 0x43c   :  { %v2540_v58 = vpop.xlane.xlu1 %2539 }
 0x43d   :  { %4652 = vrcp.f32 %v2540_v58  ;;  %v2537_v59 = vpop.xlane.xlu0 %2536 }
 0x43e   :  { %4654 = vrcp.f32 %v2537_v59 }
 0x43f   :  { %v4649_v60 = vpop.eup %4648 }
 0x440   :  { %v4651_v61 = vpop.eup %4650  ;;  %v2562_v62 = vmul.f32 %v4649_v60, %v4633_v21  ;;  %v4607_v21 = vpack.c.bf16 %v3168_v17, %v3167_v16 }
 0x441   :  { %v2561_v63 = vmul.f32 %v4651_v61, %v4635_v22  ;;  %v4604_v22 = vpack.c.bf16 %v3166_v20, %v3165_v18 }
 0x442   :  { %2570 = vst.msk [vmem:[#allocation4 + $0x8] sm:$0xff] %vm2480_vm3, %v2562_v62  ;;  %4365 = vmatmul.mubr.msk.f32.vlgmr.msra.gmra.mrb[32].mxu1 %vm2480_vm3, %v2562_v62 }
 0x443   :  { %2569 = vst.msk [vmem:[#allocation4] sm:$0xff] %vm2480_vm3, %v2561_v63  ;;  %4360 = vmatmul.mubr.msk.f32.vlgmr.msra.gmra.mrb[32].mxu0 %vm2480_vm3, %v2561_v63  ;;  %4373 = vmatpush3.msra.mxu1 %v5276_v29 }
 0x444   :  { %4368 = vmatpush3.msra.mxu0 %v5274_v28  ;;  %v2546_v0 = vpop.xlane.xlu1 %2545  ;;  %4369 = vmatprep.mubr.msk.f32.mxu0 %vm4713_vm1, %v4714_v27 }
 0x445   :  { %4656 = vrcp.f32 %v2546_v0  ;;  %v2543_v1 = vpop.xlane.xlu0 %2542  ;;  %4374 = vmatprep.mubr.msk.f32.mxu1 %vm4713_vm1, %v4714_v27  ;;  %4377 = vmatprep.subr.mxu0 %v4714_v27 }
 0x446   :  { %4658 = vrcp.f32 %v2543_v1  ;;  %4382 = vmatprep.subr.mxu1 %v4714_v27 }
 0x447   :  { %v4653_v2 = vpop.eup %4652 }
 0x448   :  { %v4655_v10 = vpop.eup %4654  ;;  %v2564_v3 = vmul.f32 %v4653_v2, %v4637_v38  ;;  %v4613_v38 = vpack.c.bf16 %v3172_v31, %v3171_v30 }
 0x449   :  { %v2563_v29 = vmul.f32 %v4655_v10, %v4639_v39  ;;  %v4610_v39 = vpack.c.bf16 %v3170_v35, %v3169_v34 }
 0x44a   :  { %2572 = vst.msk [vmem:[#allocation4 + $0x18] sm:$0xff] %vm2480_vm3, %v2564_v3  ;;  %4375 = vmatmul.mubr.msk.f32.vlgmr.msra.gmra.mrb[34].mxu1 %vm2480_vm3, %v2564_v3 }
 0x44b   :  { %2571 = vst.msk [vmem:[#allocation4 + $0x10] sm:$0xff] %vm2480_vm3, %v2563_v29  ;;  %4370 = vmatmul.mubr.msk.f32.vlgmr.msra.gmra.mrb[34].mxu0 %vm2480_vm3, %v2563_v29  ;;  %4383 = vmatpush3.msra.mxu1 %v5280_v33 }
 0x44c   :  { %4378 = vmatpush3.msra.mxu0 %v5278_v32  ;;  %v2552_v28 = vpop.xlane.xlu1 %2551  ;;  %4379 = vmatprep.mubr.msk.f32.mxu0 %vm4713_vm1, %v4714_v27  ;;  %v3163_v32 = vld [vmem:[%s5477_s6 + $0x10] sm:$0xff] }
 0x44d   :  { %4660 = vrcp.f32 %v2552_v28  ;;  %v2549_v4 = vpop.xlane.xlu0 %2548  ;;  %4384 = vmatprep.mubr.msk.f32.mxu1 %vm4713_vm1, %v4714_v27  ;;  %4387 = vmatprep.subr.mxu0 %v4714_v27  ;;  %v4601_v11 = vpack.c.bf16 %v3164_v8, %v3163_v32 }
 0x44e   :  { %4662 = vrcp.f32 %v2549_v4  ;;  %4392 = vmatprep.subr.mxu1 %v4714_v27 }
 0x44f   :  { %v4657_v5 = vpop.eup %4656 }
 0x450   :  { %v4659_v6 = vpop.eup %4658  ;;  %v2566_v7 = vmul.f32 %v4657_v5, %v4641_v48  ;;  %v4619_v48 = vpack.c.bf16 %v3176_v44, %v3175_v46 }
 0x451   :  { %v2565_v33 = vmul.f32 %v4659_v6, %v4643_v49  ;;  %v4616_v49 = vpack.c.bf16 %v3174_v47, %v3173_v45 }
 0x452   :  { %2574 = vst.msk [vmem:[#allocation4 + $0x28] sm:$0xff] %vm2480_vm3, %v2566_v7  ;;  %4385 = vmatmul.mubr.msk.f32.vlgmr.msra.gmra.mrb[36].mxu1 %vm2480_vm3, %v2566_v7 }
 0x453   :  { %2573 = vst.msk [vmem:[#allocation4 + $0x20] sm:$0xff] %vm2480_vm3, %v2565_v33  ;;  %4380 = vmatmul.mubr.msk.f32.vlgmr.msra.gmra.mrb[36].mxu0 %vm2480_vm3, %v2565_v33  ;;  %4393 = vmatpush3.msra.mxu1 %v5284_v37  ;;  %v3162_v37 = vld [vmem:[%s5477_s6 + $0x8] sm:$0xff] }
 0x454   :  { %4388 = vmatpush3.msra.mxu0 %v5282_v36  ;;  %4389 = vmatprep.mubr.msk.f32.mxu0 %vm4713_vm1, %v4714_v27  ;;  %v3161_v36 = vld [vmem:[%s5477_s6] sm:$0xff]  ;;  %s4715_s6 = smov [#allocation4]  }
 0x455   :  { %4394 = vmatprep.mubr.msk.f32.mxu1 %vm4713_vm1, %v4714_v27  ;;  %4597 = vmatprep.subr.bf16.mxu0 %v4712_v19  ;;  %v4598_v14 = vpack.c.bf16 %v3162_v37, %v3161_v36  ;;  %s3803_s13 = sshll.u32 %s4715_s6, 4  ;;  %s3804_s13 = int_to_ptr.vmem [resolvable:$true] %s3803_s13 }
 0x456   :  { %4600 = vmatprep.subr.bf16.mxu1 %v4712_v19  ;;  %s4664_s14 = scalar_lea.vmem %s3804_s13, 1024  ;;  %p4669_p1 = scmp.lt.s32.totalorder %s3804_s13, %s3804_s13 }
 0x457   :  { %v4661_v9 = vpop.eup %4660  ;;  %p4665_p0 = scmp.ne.s32.totalorder %s3804_s13, %s4664_s14  ;;  %p4670_p2 = scmp.lt.s32.totalorder %s4664_s14, %s4664_s14 }
 0x458   :  { %v4663_v12 = vpop.eup %4662  ;;  %v2568_v13 = vmul.f32 %v4661_v9, %v5300_v52 }
 0x459   :  { %v2567_v15 = vmul.f32 %v4663_v12, %v5302_v53  ;;  %p4671_p3 = por %p4670_p2, %p4669_p1 }
 0x45a   :  { %2576 = vst.msk [vmem:[#allocation4 + $0x38] sm:$0xff] %vm2480_vm3, %v2568_v13  ;;  %4395 = vmatmul.mubr.msk.f32.vlgmr.msra.gmra.mrb[38].mxu1 %vm2480_vm3, %v2568_v13 }
 0x45b   :  { %2575 = vst.msk [vmem:[#allocation4 + $0x30] sm:$0xff] %vm2480_vm3, %v2567_v15  ;;  %4390 = vmatmul.mubr.msk.f32.vlgmr.msra.gmra.mrb[38].mxu0 %vm2480_vm3, %v2567_v15  ;;  %4602 = vmatpush3.bf16.msra.mxu1 %v4601_v11  ;;  %p4672_p4 = pnand %p4671_p3, %p4665_p0 }
 0x45c   :  { %4599 = vmatpush3.bf16.msra.mxu0 %v4598_v14  ;;  %4401 = vmatprep.mubr.msk.f32.mxu0 %vm4713_vm1, %v4714_v27 }
 0x45d   :  { %4408 = vmatprep.mubr.msk.f32.mxu1 %vm4713_vm1, %v4714_v27  ;;  %4603 = vmatprep.subr.bf16.mxu0 %v4712_v19 }
 0x45e   :  { %4606 = vmatprep.subr.bf16.mxu1 %v4712_v19 }
 0x515   :  { %v2719_v23 = vpop.f32.mrb[32].mxu1 }
 0x516   :  { %v2646_v24 = vpop.f32.mrb[32].mxu0  ;;  %v4366_v25 = vpop.f32.mrb[33].mxu1  ;;  %4409 = vmatmul.mubr.msk.f32.vlgmr.msra.gmra.mrb[40].mxu1 %vm1863_vm2, %v2719_v23 }
 0x517   :  { %v4361_v26 = vpop.f32.mrb[33].mxu0  ;;  %4402 = vmatmul.mubr.msk.f32.vlgmr.msra.gmra.mrb[40].mxu0 %vm1863_vm2, %v2646_v24  ;;  %4608 = vmatpush3.bf16.msra.mxu1 %v4607_v21 }
 0x518   :  { %4605 = vmatpush3.bf16.msra.mxu0 %v4604_v22  ;;  %4415 = vmatprep.mubr.msk.f32.mxu0 %vm4713_vm1, %v4714_v27 }
 0x519   :  { %4422 = vmatprep.mubr.msk.f32.mxu1 %vm4713_vm1, %v4714_v27  ;;  %4609 = vmatprep.subr.bf16.mxu0 %v4712_v19 }
 0x51a   :  { %4612 = vmatprep.subr.bf16.mxu1 %v4712_v19 }
 0x51d   :  { %v2865_v40 = vpop.f32.mrb[34].mxu1 }
 0x51e   :  { %v2792_v41 = vpop.f32.mrb[34].mxu0  ;;  %v4376_v42 = vpop.f32.mrb[35].mxu1  ;;  %4423 = vmatmul.mubr.msk.f32.vlgmr.msra.gmra.mrb[42].mxu1 %vm1863_vm2, %v2865_v40 }
 0x51f   :  { %v4371_v43 = vpop.f32.mrb[35].mxu0  ;;  %4416 = vmatmul.mubr.msk.f32.vlgmr.msra.gmra.mrb[42].mxu0 %vm1863_vm2, %v2792_v41  ;;  %4614 = vmatpush3.bf16.msra.mxu1 %v4613_v38 }
 0x520   :  { %4611 = vmatpush3.bf16.msra.mxu0 %v4610_v39  ;;  %4429 = vmatprep.mubr.msk.f32.mxu0 %vm4713_vm1, %v4714_v27 }
 0x521   :  { %4436 = vmatprep.mubr.msk.f32.mxu1 %vm4713_vm1, %v4714_v27  ;;  %4615 = vmatprep.subr.bf16.mxu0 %v4712_v19 }
 0x522   :  { %4618 = vmatprep.subr.bf16.mxu1 %v4712_v19 }
 0x525   :  { %v3011_v50 = vpop.f32.mrb[36].mxu1 }
 0x526   :  { %v2938_v51 = vpop.f32.mrb[36].mxu0  ;;  %v4386_v52 = vpop.f32.mrb[37].mxu1  ;;  %4437 = vmatmul.mubr.msk.f32.vlgmr.msra.gmra.mrb[44].mxu1 %vm1863_vm2, %v3011_v50 }
 0x527   :  { %v4381_v53 = vpop.f32.mrb[37].mxu0  ;;  %4430 = vmatmul.mubr.msk.f32.vlgmr.msra.gmra.mrb[44].mxu0 %vm1863_vm2, %v2938_v51  ;;  %4620 = vmatpush3.bf16.msra.mxu1 %v4619_v48 }
 0x528   :  { %4617 = vmatpush3.bf16.msra.mxu0 %v4616_v49  ;;  %4443 = vmatprep.mubr.msk.f32.mxu0 %vm4713_vm1, %v4714_v27 }
 0x529   :  { %4450 = vmatprep.mubr.msk.f32.mxu1 %vm4713_vm1, %v4714_v27 }
 0x52d   :  { %v3157_v54 = vpop.f32.mrb[38].mxu1 }
 0x52e   :  { %v3084_v19 = vpop.f32.mrb[38].mxu0  ;;  %v4396_v55 = vpop.f32.mrb[39].mxu1  ;;  %4451 = vmatmul.mubr.msk.f32.vlgmr.msra.gmra.mrb[46].mxu1 %vm1863_vm2, %v3157_v54 }
 0x52f   :  { %v4391_v56 = vpop.f32.mrb[39].mxu0  ;;  %4444 = vmatmul.mubr.msk.f32.vlgmr.msra.gmra.mrb[46].mxu0 %vm1863_vm2, %v3084_v19 }
 0x530   :  { %4675 = shalt.err (!%p4672_p4)
}
 0x531   :  { %s4676_s1 = scalar_lea.hbm %s5480_s9, 1024 }
 0x532   :  { %p4677_p5 = scmp.ne.s32.totalorder %s5480_s9, %s4676_s1  ;;  %p4680_p6 = scmp.lt.u32.totalorder %s4676_s1, %s5480_s9 }
 0x534   :  { %p4682_p7 = pnand %p4680_p6, %p4677_p5 }
 0x536   :  { %4685 = shalt.err (!%p4682_p7)
}
 0x537   :  { %s4716_s21 = smov 128   ;;  %s4717_s22 = smov 8   ;;  %v3876_v28 = vld [vmem:[%s5478_s7] ss:$0 sm:$0xff] }
 0x538   :  { %3809 = dma.vmem_to_hbm [thread:$0]  %s3804_s13, 1024, %s5480_s9, [#allocation5], %s4716_s21, %s4716_s21, %s4717_s22  }
 0x539   :  { %s4718_s7 = smov [#allocation2]  }
 0x53a   :  { %s3791_s2 = sshll.u32 %s4718_s7, 4  ;;  %s3792_s2 = int_to_ptr.vmem [resolvable:$true] %s3791_s2 }
 0x53b   :  { %s4686_s25 = scalar_lea.vmem %s3792_s2, 256  ;;  %p4691_p9 = scmp.lt.s32.totalorder %s3792_s2, %s3792_s2 }
 0x53c   :  { %p4687_p8 = scmp.ne.s32.totalorder %s3792_s2, %s4686_s25  ;;  %p4692_p10 = scmp.lt.s32.totalorder %s4686_s25, %s4686_s25 }
 0x53e   :  { %p4693_p11 = por %p4692_p10, %p4691_p9 }
 0x540   :  { %p4694_p12 = pnand %p4693_p11, %p4687_p8 }
 0x5e9   :  { %v3319_v27 = vpop.f32.mrb[40].mxu1 }
 0x5ea   :  { %v3246_v57 = vpop.f32.mrb[40].mxu0  ;;  %v3762_v58 = vsel %vm35_vm0, %v3319_v27, 0.0  ;;  %v4410_v59 = vpop.f32.mrb[41].mxu1 }
 0x5eb   :  { %v3761_v60 = vsel %vm35_vm0, %v3246_v57, 0.0  ;;  %v4403_v61 = vpop.f32.mrb[41].mxu0 }
 0x5ec   :  { %v3763_v62 = vadd.f32 %v3762_v58, %v3761_v60 }
 0x5f1   :  { %v3465_v63 = vpop.f32.mrb[42].mxu1 }
 0x5f2   :  { %v3392_v0 = vpop.f32.mrb[42].mxu0  ;;  %v4424_v1 = vpop.f32.mrb[43].mxu1  ;;  %v3766_v29 = vsel %vm35_vm0, %v3465_v63, 0.0 }
 0x5f3   :  { %v3764_v2 = vsel %vm35_vm0, %v3392_v0, 0.0  ;;  %v4417_v10 = vpop.f32.mrb[43].mxu0 }
 0x5f4   :  { %v3765_v3 = vadd.f32 %v3764_v2, %v3763_v62 }
 0x5f6   :  { %v3767_v4 = vadd.f32 %v3766_v29, %v3765_v3 }
 0x5f8   :  { %v3782_v5 = vadd.f32 %v3876_v28, %v3767_v4 }
 0x5f9   :  { %v3611_v6 = vpop.f32.mrb[44].mxu1 }
 0x5fa   :  { %3784 = vst.msk [vmem:[#allocation2] sm:$0xff] %vm35_vm0, %v3782_v5  ;;  %v3538_v7 = vpop.f32.mrb[44].mxu0  ;;  %v3769_v33 = vsel %vm35_vm0, %v3611_v6, 0.0  ;;  %v4438_v32 = vpop.f32.mrb[45].mxu1 }
 0x5fb   :  { %v3768_v8 = vsel %vm35_vm0, %v3538_v7, 0.0  ;;  %v4431_v36 = vpop.f32.mrb[45].mxu0 }
 0x5fc   :  { %v3770_v37 = vadd.f32 %v3769_v33, %v3768_v8 }
 0x601   :  { %v3757_v9 = vpop.f32.mrb[46].mxu1 }
 0x602   :  { %v3684_v11 = vpop.f32.mrb[46].mxu0  ;;  %v4452_v12 = vpop.f32.mrb[47].mxu1  ;;  %v3773_v16 = vsel %vm35_vm0, %v3757_v9, 0.0 }
 0x603   :  { %v3771_v13 = vsel %vm35_vm0, %v3684_v11, 0.0  ;;  %v4445_v14 = vpop.f32.mrb[47].mxu0 }
 0x604   :  { %v3772_v15 = vadd.f32 %v3771_v13, %v3770_v37 }
 0x606   :  { %v3774_v17 = vadd.f32 %v3773_v16, %v3772_v15 }
 0x608   :  { %v3783_v18 = vadd.f32 %v3876_v28, %v3774_v17 }
 0x60a   :  { %3785 = vst.msk [vmem:[#allocation2 + $0x8] sm:$0xff] %vm35_vm0, %v3783_v18 }
 0x60b   :  { %4697 = shalt.err (!%p4694_p12)
}
 0x60c   :  { %s4698_s28 = scalar_lea.hbm %s5479_s8, 256 }
 0x60d   :  { %p4699_p13 = scmp.ne.s32.totalorder %s5479_s8, %s4698_s28  ;;  %p4702_p0 = scmp.lt.u32.totalorder %s4698_s28, %s5479_s8 }
 0x60f   :  { %p4704_p1 = pnand %p4702_p0, %p4699_p13 }
 0x611   :  { %4707 = shalt.err (!%p4704_p1)
}
 0x612   :  { %3797 = dma.vmem_to_hbm [thread:$0]  %s3792_s2, 256, %s5479_s8, [#allocation3], %s4716_s21, %s4716_s21, %s4717_s22  }
 0x613   :  { %4708 = dma.done.wait [#allocation3], 256  }
 0x614   :  { %4709 = vsyncadd [#allocation3], 4294967040 }
 0x615   :  { %4710 = dma.done.wait [#allocation5], 1024  }
 0x616   :  { %4711 = vsyncadd [#allocation5], 4294966272 }
 0x617   :  { %3816 = vsyncpa [#allocation3], 1 }
 0x618   :  { %3817 = vsyncpa [#allocation5], 1 }

</bundles_post_ra>
